<compile_context>
chip_gen: v5e
topology: v5e:2x2
jax: 0.10.0
libtpu: 0.0.40
codegen_flags: <defaults>
</compile_context>

<pallas_src>
import jax
import jax.numpy as jnp
from jax.experimental import pallas as pl
from jax.experimental.pallas import tpu as pltpu

_LANE = 128
_SUBLANE = 8
_MAX_LANE_COLS = 1024          # up to 8 vregs wide per row
_MAX_BLOCK_ROWS = 512          # 512 x 1024 f32 = 2 MiB per tile


def _relu_add_kernel(x_ref, o_ref):
    x = x_ref[...]
    # relu(x) + x, all VPU elementwise on the resident tile.
    o_ref[...] = jnp.maximum(x, jnp.zeros_like(x)) + x


def _round_up(a, b):
    return pl.cdiv(a, b) * b


def simple_nn_forward(x):
    """Pallas implementation of SimpleNN.forward: x.relu().add(x)."""
    orig_shape = x.shape
    flat = x.reshape(-1)
    n = flat.shape[0]

    # Lane-dense column count: multiple of 128, capped at _MAX_LANE_COLS.
    cols = _LANE * min(_MAX_LANE_COLS // _LANE, max(1, pl.cdiv(n, _LANE)))
    rows_total = pl.cdiv(n, cols)

    # Sublane-aligned rows; row tile capped at _MAX_BLOCK_ROWS, and rows are
    # padded to a multiple of the tile so the grid divides evenly (worst-case
    # extra padding < one tile ~= 2 MiB, negligible vs. large inputs).
    rows_aligned = _round_up(rows_total, _SUBLANE)
    block_rows = min(_MAX_BLOCK_ROWS, rows_aligned)
    rows_padded = _round_up(rows_aligned, block_rows)

    padded_n = rows_padded * cols
    if padded_n != n:
        flat = jnp.pad(flat, (0, padded_n - n))
    x2d = flat.reshape(rows_padded, cols)

    grid = (rows_padded // block_rows,)

    out = pl.pallas_call(
        _relu_add_kernel,
        out_shape=jax.ShapeDtypeStruct(x2d.shape, x2d.dtype),
        grid=grid,
        in_specs=[pl.BlockSpec((block_rows, cols), lambda i: (i, 0))],
        out_specs=pl.BlockSpec((block_rows, cols), lambda i: (i, 0)),
        compiler_params=pltpu.CompilerParams(
            dimension_semantics=("parallel",),   # shards grid over 2 TCs on v7x
            vmem_limit_bytes=32 * 1024 * 1024,   # <= 8 MiB actually resident
        ),
    )(x2d)

    return out.reshape(-1)[:n].reshape(orig_shape)


if __name__ == "__main__":
    key = jax.random.PRNGKey(0)

    # Matches `t = torch.randn(10)` in the reference script (single-block path).
    x_small = jax.random.normal(key, (10,), dtype=jnp.float32)
    y_small = simple_nn_forward(x_small)
    jax.block_until_ready(y_small)
    ref_small = jnp.maximum(x_small, 0.0) + x_small
    assert y_small.shape == x_small.shape
    assert jnp.allclose(y_small, ref_small, atol=1e-6), "mismatch vs reference (small)"

    # Exercises the padded, multi-tile grid path (grid > 1, lane-dense slabs).
    x_big = jax.random.normal(jax.random.PRNGKey(1), (600 * 1024 + 5,), dtype=jnp.float32)
    y_big = simple_nn_forward(x_big)
    jax.block_until_ready(y_big)
    ref_big = jnp.maximum(x_big, 0.0) + x_big
    assert jnp.allclose(y_big, ref_big, atol=1e-6), "mismatch vs reference (big)"

    print("KERNEL_OK")
</pallas_src>

<mosaic_0001>
module attributes {stable_mosaic.version = 11 : i64} {
  func.func @_relu_add_kernel(%arg0: i32, %arg1: memref<8x128xf32, #tpu.memory_space<vmem>>, %arg2: memref<8x128xf32, #tpu.memory_space<vmem>>) attributes {dimension_semantics = [#tpu.dimension_semantics<parallel>], iteration_bounds = array<i64: 1>, scalar_prefetch = 0 : i64, scratch_operands = 0 : i64, tpu.core_type = #tpu.core_type<tc>, window_params = [{transform_indices = @transform_0, window_bounds = array<i64: 8, 128>}, {transform_indices = @transform_1, window_bounds = array<i64: 8, 128>}]} {
    %c0 = arith.constant 0 : index
    %c0_0 = arith.constant 0 : index
    %0 = vector.load %arg1[%c0, %c0_0] : memref<8x128xf32, #tpu.memory_space<vmem>>, vector<8x128xf32>
    %cst = arith.constant 0.000000e+00 : f32
    %1 = vector.broadcast %cst : f32 to vector<8x128xf32>
    %2 = arith.maximumf %0, %1 : vector<8x128xf32>
    %3 = arith.addf %2, %0 : vector<8x128xf32>
    %c0_1 = arith.constant 0 : index
    %c0_2 = arith.constant 0 : index
    %4 = vector.load %arg2[%c0_1, %c0_2] : memref<8x128xf32, #tpu.memory_space<vmem>>, vector<8x128xf32>
    tpu.vector_store %arg2[%c0_1, %c0_2], %3 {strides = array<i32>} : memref<8x128xf32, #tpu.memory_space<vmem>>, vector<8x128xf32>,
    return
  }
  func.func @transform_0(%arg0: i32) -> (i32, i32) {
    %c0_i32 = arith.constant 0 : i32
    %c0_i32_0 = arith.constant 0 : i32
    return %arg0, %c0_i32 : i32, i32
  }
  func.func @transform_1(%arg0: i32) -> (i32, i32) {
    %c0_i32 = arith.constant 0 : i32
    %c0_i32_0 = arith.constant 0 : i32
    return %arg0, %c0_i32 : i32, i32
  }
}

</mosaic_0001>

<bundles_post_ra>
// kernel: tpu_custom_call.1
= control target key start
LH: loop header
LB: loop body
LE: loop exit
PB: predicated region body
PF: predicated region fallthrough
CT: control target
= control target key end

     0   :  { %6 = vsyncpa [#allocation3], 0  ;;  %s116_s0 = inlined_call_operand.hbm [shape: f32[8,128], index: 0, kind: input, shape index: {}]   ;;  %s117_s1 = inlined_call_operand.hbm [shape: f32[8,128], index: 1, kind: output, shape index: {}]  }
   0x1   :  { %7 = vsyncpa [#allocation4], 0  ;;  %s13_s8 = sshll.u32 %s116_s0, 4  ;;  %s98_s9 = smov [#allocation2]   ;;  %s14_s8 = int_to_ptr.hbm [resolvable:$true] %s13_s8 }
   0x2   :  { %s15_s10 = sshll.u32 %s98_s9, 4  ;;  %s16_s10 = int_to_ptr.vmem [resolvable:$true] %s15_s10 }
   0x3   :  { %18 = dma.hbm_to_vmem [thread:$0]  %s14_s8, 128, %s16_s10, [#allocation3]  }
   0x4   :  { %94 = dma.done.wait [#allocation3], 128  }
   0x5   :  { %95 = vsyncadd [#allocation3], 4294967168  ;;  %v23_v0 = vld [vmem:[#allocation2] sm:$0xff]  ;;  %s99_s11 = smov [#allocation5]   ;;  %s34_s15 = sshll.u32 %s117_s1, 4  ;;  %s35_s15 = int_to_ptr.hbm [resolvable:$true] %s34_s15 }
   0x6   :  { %s32_s12 = sshll.u32 %s99_s11, 4  ;;  %v24_v1 = vmax.f32 %v23_v0, 0.0  ;;  %s33_s12 = int_to_ptr.vmem [resolvable:$true] %s32_s12 }
   0x8   :  { %v25_v2 = vadd.f32 %v24_v1, %v23_v0 }
   0xa   :  { %26 = vst [vmem:[#allocation5] sm:$0xff] %v25_v2 }
   0xb   :  { %37 = dma.vmem_to_hbm [thread:$0]  %s33_s12, 128, %s35_s15, [#allocation4]  }
   0xc   :  { %96 = dma.done.wait [#allocation4], 128  }
   0xd   :  { %97 = vsyncadd [#allocation4], 4294967168 }
   0xe   :  { %42 = vsyncpa [#allocation3], 1 }
   0xf   :  { %43 = vsyncpa [#allocation4], 1 }

</bundles_post_ra>
